<compile_context>
chip_gen: v7x
topology: tpu7x:2x2x1
jax: 0.10.0
libtpu: 0.0.40
codegen_flags: <defaults>
</compile_context>

<pallas_src>
import jax
import jax.numpy as jnp
from jax.experimental import pallas as pl
from jax.experimental.pallas import tpu as pltpu


def _round_up(x, m):
    return ((x + m - 1) // m) * m


def _mlp_kernel(x_ref, w1_ref, b1_ref, w2_ref, b2_ref, o_ref):
    # x_ref : (C_in, T)      channel-major tile of pixels (T on the lane axis)
    # w1_ref: (C_hid, C_in)  fc1 weight (PyTorch Conv2d 1x1 orientation)
    # b1_ref: (C_hid, 1)
    # w2_ref: (C_out, C_hid) fc2 weight
    # b2_ref: (C_out, 1)
    # o_ref : (C_out, T)
    x = x_ref[...]
    h = jnp.dot(w1_ref[...], x, preferred_element_type=jnp.float32) + b1_ref[...]
    # tanh-form GELU -> transcendental lands on the EUP slot (free), not the VALU slot.
    # Slight deviation from PyTorch nn.GELU (exact erf); tolerance sign-off in __main__.
    h = jax.nn.gelu(h, approximate=True)
    # TODO(synk): on v6e/v7x the activation math could run in bf16 (2 elems/lane on
    # VALU/EUP) for ~2x elementwise throughput; kept f32 here for precision.
    # drop = 0.0 -> identity  # TODO(synk): dropout with p>0 would need pltpu PRNG masking
    o = jnp.dot(w2_ref[...], h, preferred_element_type=jnp.float32) + b2_ref[...]
    o_ref[...] = o.astype(o_ref.dtype)


def _sublane_pad(c, itemsize):
    # Sublane multiple for a dtype: native tile is 8 sublanes of 32-bit words,
    # sub-32-bit dtypes pack along sublanes (bf16 -> 16, int8 -> 32).
    return _round_up(c, max(8, 32 // itemsize))


def _cap_tile_for_vmem(tile, c_in, c_hid, c_out, x_itemsize, w_itemsize, budget_bytes):
    """Largest 128-multiple spatial tile whose double-buffered in/out tiles, the
    (double-buffered) resident weight/bias blocks and both f32 intermediates fit
    the given VMEM budget."""
    c_in_p = _sublane_pad(c_in, x_itemsize)
    c_out_p = _sublane_pad(c_out, x_itemsize)
    c_hid_f32 = _sublane_pad(c_hid, 4)
    c_out_f32 = _sublane_pad(c_out, 4)

    c_in_w = _sublane_pad(c_in, w_itemsize)
    c_hid_w = _sublane_pad(c_hid, w_itemsize)
    c_out_w = _sublane_pad(c_out, w_itemsize)
    # Weight + bias blocks (constant index_maps, but conservatively count the
    # double-buffered allocation Pallas makes for every input spec).  Bias (C, 1)
    # blocks pad the lane axis to 128.
    weight_bytes = 2 * (c_hid_w * c_in_w + c_out_w * c_hid_w
                        + c_hid_w * 128 + c_out_w * 128) * w_itemsize

    per_lane = (2 * c_in_p * x_itemsize      # x tile, double-buffered
                + 2 * c_out_p * x_itemsize   # out tile, double-buffered
                + c_hid_f32 * 4              # f32 hidden activation h
                + c_out_f32 * 4)             # f32 output intermediate o

    while tile > 128 and weight_bytes + per_lane * tile > budget_bytes:
        tile -= 128
    return max(tile, 128)


def mlp_pallas(x_nchw, w1, b1, w2, b2, *, hw_tile=4096):
    """x_nchw: [B, C_in, H, W]; w1: [C_hid, C_in]; b1: [C_hid];
    w2: [C_out, C_hid]; b2: [C_out]. Returns [B, C_out, H, W]."""
    B, C_in, H, W = x_nchw.shape
    C_hid = w1.shape[0]
    C_out = w2.shape[0]
    HW = H * W
    x_itemsize = jnp.dtype(x_nchw.dtype).itemsize
    w_itemsize = jnp.dtype(w1.dtype).itemsize

    # Generation-aware VMEM budget (128 MiB v5e/v6e, 64 MiB v7x physical).
    try:
        vmem_cap = int(pltpu.get_tpu_info().vmem_capacity_bytes)
    except Exception:
        vmem_cap = 64 * 1024 * 1024  # conservative (v7x) fallback
    budget = max(vmem_cap // 2, 16 * 1024 * 1024)

    # Lane-aligned spatial tile: as big as the problem / VMEM budget allow.
    tile = min(_round_up(hw_tile, 128), _round_up(HW, 128))
    tile = _cap_tile_for_vmem(tile, C_in, C_hid, C_out, x_itemsize, w_itemsize, budget)

    # Keep >=2 grid steps so v7x's two TensorCores both get work and the
    # software pipeline has some depth (no-op on v5e/v6e beyond pipelining).
    while tile > 128 and B * pl.cdiv(HW, tile) < 2:
        tile = max(128, _round_up(tile // 2, 128))

    # NCHW is already channel-major: this reshape is free (no transpose).
    x = x_nchw.reshape(B, C_in, HW)
    b1_2d = b1.reshape(C_hid, 1)
    b2_2d = b2.reshape(C_out, 1)

    # Ragged last block handled by Pallas (masked boundary writes) -> no pad/slice.
    grid = (B, pl.cdiv(HW, tile))

    flops = 2 * B * HW * (C_in * C_hid + C_hid * C_out)
    transcendentals = B * HW * C_hid  # one tanh per hidden element
    bytes_accessed = (
        B * HW * (C_in + C_out) * x_itemsize
        + (w1.size + w2.size + b1.size + b2.size) * w_itemsize
    )

    vmem_limit = int(min(vmem_cap - (4 << 20), budget + (8 << 20)))

    # TODO(synk): at production MetaFormer widths (C_hid in the thousands) add a
    # hidden-channel grid axis ("arbitrary") with an f32 accumulator scratch so the
    # full weights + hidden tile need not be resident at once on v7x's 64 MiB VMEM.
    out = pl.pallas_call(
        _mlp_kernel,
        out_shape=jax.ShapeDtypeStruct((B, C_out, HW), x_nchw.dtype),
        grid_spec=pltpu.PrefetchScalarGridSpec(
            num_scalar_prefetch=0,
            grid=grid,
            in_specs=[
                # batch dim squeezed; spatial tile on the lane axis
                pl.BlockSpec((None, C_in, tile), lambda b, j: (b, 0, j)),
                pl.BlockSpec((C_hid, C_in), lambda b, j: (0, 0)),
                pl.BlockSpec((C_hid, 1), lambda b, j: (0, 0)),
                pl.BlockSpec((C_out, C_hid), lambda b, j: (0, 0)),
                pl.BlockSpec((C_out, 1), lambda b, j: (0, 0)),
            ],
            out_specs=pl.BlockSpec((None, C_out, tile), lambda b, j: (b, 0, j)),
        ),
        compiler_params=pltpu.CompilerParams(
            dimension_semantics=("parallel", "parallel"),
            vmem_limit_bytes=vmem_limit,
        ),
        cost_estimate=pl.CostEstimate(
            flops=flops,
            transcendentals=transcendentals,
            bytes_accessed=bytes_accessed,
        ),
    )(x, w1, b1_2d, w2, b2_2d)

    return out.reshape(B, C_out, H, W)  # already NCHW — no transpose needed


def mlp_reference(x_nchw, w1, b1, w2, b2):
    """Pure-JAX reference mirroring the PyTorch forward (1x1 convs + exact erf GELU)."""
    h = jnp.einsum("oc,bchw->bohw", w1, x_nchw) + b1[None, :, None, None]
    h = jax.nn.gelu(h, approximate=False)
    o = jnp.einsum("oc,bchw->bohw", w2, h) + b2[None, :, None, None]
    return o


if __name__ == "__main__":
    # Module config: in_features=4, hidden_features=32, out_features=4
    B, C_in, H, W = 2, 4, 16, 16
    C_hid, C_out = 32, 4

    key = jax.random.PRNGKey(0)
    k_x, k_w1, k_b1, k_w2, k_b2 = jax.random.split(key, 5)

    x = jax.random.normal(k_x, (B, C_in, H, W), dtype=jnp.float32)

    # Conv2d(C_in, C_hid, 1) weight in PyTorch is (C_hid, C_in, 1, 1); we store
    # the squeezed (C_hid, C_in) form directly (native channel-major orientation).
    w1 = 0.1 * jax.random.normal(k_w1, (C_hid, C_in), dtype=jnp.float32)
    b1 = 0.1 * jax.random.normal(k_b1, (C_hid,), dtype=jnp.float32)
    w2 = 0.1 * jax.random.normal(k_w2, (C_out, C_hid), dtype=jnp.float32)
    b2 = 0.1 * jax.random.normal(k_b2, (C_out,), dtype=jnp.float32)

    out = mlp_pallas(x, w1, b1, w2, b2)
    out = jax.block_until_ready(out)

    ref = mlp_reference(x, w1, b1, w2, b2)
    assert out.shape == (B, C_out, H, W), out.shape
    # Tolerance sign-off: kernel uses tanh-approx GELU (EUP) vs exact erf reference.
    assert jnp.allclose(out, ref, atol=2e-3, rtol=2e-3), "mismatch vs reference"

    print("KERNEL_OK")
</pallas_src>

<mosaic_0001>
module attributes {stable_mosaic.version = 11 : i64} {
  func.func @_mlp_kernel(%arg0: i32, %arg1: i32, %arg2: memref<1x4x256xf32, #tpu.memory_space<vmem>>, %arg3: memref<32x4xf32, #tpu.memory_space<vmem>>, %arg4: memref<32x1xf32, #tpu.memory_space<vmem>>, %arg5: memref<4x32xf32, #tpu.memory_space<vmem>>, %arg6: memref<4x1xf32, #tpu.memory_space<vmem>>, %arg7: memref<1x4x256xf32, #tpu.memory_space<vmem>>) attributes {dimension_semantics = [#tpu.dimension_semantics<parallel>, #tpu.dimension_semantics<parallel>], iteration_bounds = array<i64: 2, 1>, scalar_prefetch = 0 : i64, scratch_operands = 0 : i64, tpu.core_type = #tpu.core_type<tc>, window_params = [{transform_indices = @transform_0, window_bounds = array<i64: 1, 4, 256>}, {pipeline_mode = #tpu.pipeline_mode<synchronous>, transform_indices = @transform_1, window_bounds = array<i64: 32, 4>}, {pipeline_mode = #tpu.pipeline_mode<synchronous>, transform_indices = @transform_2, window_bounds = array<i64: 32, 1>}, {pipeline_mode = #tpu.pipeline_mode<synchronous>, transform_indices = @transform_3, window_bounds = array<i64: 4, 32>}, {pipeline_mode = #tpu.pipeline_mode<synchronous>, transform_indices = @transform_4, window_bounds = array<i64: 4, 1>}, {transform_indices = @transform_5, window_bounds = array<i64: 1, 4, 256>}]} {
    %c0 = arith.constant 0 : index
    %c0_0 = arith.constant 0 : index
    %c0_1 = arith.constant 0 : index
    %0 = vector.load %arg2[%c0, %c0_0, %c0_1] : memref<1x4x256xf32, #tpu.memory_space<vmem>>, vector<1x4x256xf32>
    %1 = vector.shape_cast %0 : vector<1x4x256xf32> to vector<4x256xf32>
    %c0_2 = arith.constant 0 : index
    %c0_3 = arith.constant 0 : index
    %2 = vector.load %arg3[%c0_2, %c0_3] : memref<32x4xf32, #tpu.memory_space<vmem>>, vector<32x4xf32>
    %cst = arith.constant dense<0.000000e+00> : vector<32x256xf32>
    %3 = tpu.matmul %2, %1, %cst {dimension_numbers = #tpu.dot_dimension_numbers<[1], [0], [0], [1], [0, 0, 1, 1], [], []>} : vector<32x4xf32>, vector<4x256xf32>, vector<32x256xf32> -> vector<32x256xf32>
    %c0_4 = arith.constant 0 : index
    %c0_5 = arith.constant 0 : index
    %4 = vector.load %arg4[%c0_4, %c0_5] : memref<32x1xf32, #tpu.memory_space<vmem>>, vector<32x1xf32>
    %5 = vector.broadcast %4 : vector<32x1xf32> to vector<32x256xf32>
    %6 = arith.addf %3, %5 : vector<32x256xf32>
    %7 = arith.mulf %6, %6 : vector<32x256xf32>
    %8 = arith.mulf %6, %7 : vector<32x256xf32>
    %cst_6 = arith.constant 4.471500e-02 : f32
    %9 = vector.broadcast %cst_6 : f32 to vector<32x256xf32>
    %10 = arith.mulf %9, %8 : vector<32x256xf32>
    %11 = arith.addf %6, %10 : vector<32x256xf32>
    %cst_7 = arith.constant 0.797884583 : f32
    %12 = vector.broadcast %cst_7 : f32 to vector<32x256xf32>
    %13 = arith.mulf %12, %11 : vector<32x256xf32>
    %14 = math.tanh %13 : vector<32x256xf32>
    %cst_8 = arith.constant 1.000000e+00 : f32
    %15 = vector.broadcast %cst_8 : f32 to vector<32x256xf32>
    %16 = arith.addf %15, %14 : vector<32x256xf32>
    %cst_9 = arith.constant 5.000000e-01 : f32
    %17 = vector.broadcast %cst_9 : f32 to vector<32x256xf32>
    %18 = arith.mulf %17, %16 : vector<32x256xf32>
    %19 = arith.mulf %6, %18 : vector<32x256xf32>
    %c0_10 = arith.constant 0 : index
    %c0_11 = arith.constant 0 : index
    %20 = vector.load %arg5[%c0_10, %c0_11] : memref<4x32xf32, #tpu.memory_space<vmem>>, vector<4x32xf32>
    %cst_12 = arith.constant dense<0.000000e+00> : vector<4x256xf32>
    %21 = tpu.matmul %20, %19, %cst_12 {dimension_numbers = #tpu.dot_dimension_numbers<[1], [0], [0], [1], [0, 0, 1, 1], [], []>} : vector<4x32xf32>, vector<32x256xf32>, vector<4x256xf32> -> vector<4x256xf32>
    %c0_13 = arith.constant 0 : index
    %c0_14 = arith.constant 0 : index
    %22 = vector.load %arg6[%c0_13, %c0_14] : memref<4x1xf32, #tpu.memory_space<vmem>>, vector<4x1xf32>
    %23 = vector.broadcast %22 : vector<4x1xf32> to vector<4x256xf32>
    %24 = arith.addf %21, %23 : vector<4x256xf32>
    %c0_15 = arith.constant 0 : index
    %c0_16 = arith.constant 0 : index
    %c0_17 = arith.constant 0 : index
    %25 = vector.load %arg7[%c0_15, %c0_16, %c0_17] : memref<1x4x256xf32, #tpu.memory_space<vmem>>, vector<1x4x256xf32>
    %26 = vector.shape_cast %25 : vector<1x4x256xf32> to vector<4x256xf32>
    %27 = vector.shape_cast %24 : vector<4x256xf32> to vector<1x4x256xf32>
    tpu.vector_store %arg7[%c0_15, %c0_16, %c0_17], %27 {strides = array<i32>} : memref<1x4x256xf32, #tpu.memory_space<vmem>>, vector<1x4x256xf32>,
    return
  }
  func.func @transform_0(%arg0: i32, %arg1: i32) -> (i32, i32, i32) {
    %c0_i32 = arith.constant 0 : i32
    %c0_i32_0 = arith.constant 0 : i32
    return %arg0, %c0_i32, %arg1 : i32, i32, i32
  }
  func.func @transform_1(%arg0: i32, %arg1: i32) -> (i32, i32) {
    %c0_i32 = arith.constant 0 : i32
    %c0_i32_0 = arith.constant 0 : i32
    %c0_i32_1 = arith.constant 0 : i32
    return %c0_i32, %c0_i32_0 : i32, i32
  }
  func.func @transform_2(%arg0: i32, %arg1: i32) -> (i32, i32) {
    %c0_i32 = arith.constant 0 : i32
    %c0_i32_0 = arith.constant 0 : i32
    %c0_i32_1 = arith.constant 0 : i32
    return %c0_i32, %c0_i32_0 : i32, i32
  }
  func.func @transform_3(%arg0: i32, %arg1: i32) -> (i32, i32) {
    %c0_i32 = arith.constant 0 : i32
    %c0_i32_0 = arith.constant 0 : i32
    %c0_i32_1 = arith.constant 0 : i32
    return %c0_i32, %c0_i32_0 : i32, i32
  }
  func.func @transform_4(%arg0: i32, %arg1: i32) -> (i32, i32) {
    %c0_i32 = arith.constant 0 : i32
    %c0_i32_0 = arith.constant 0 : i32
    %c0_i32_1 = arith.constant 0 : i32
    return %c0_i32, %c0_i32_0 : i32, i32
  }
  func.func @transform_5(%arg0: i32, %arg1: i32) -> (i32, i32, i32) {
    %c0_i32 = arith.constant 0 : i32
    %c0_i32_0 = arith.constant 0 : i32
    return %arg0, %c0_i32, %arg1 : i32, i32, i32
  }
}

</mosaic_0001>

<bundles_post_ra>
// kernel: tpu_custom_call.1
= control target key start
LH: loop header
LB: loop body
LE: loop exit
PB: predicated region body
PF: predicated region fallthrough
CT: control target
= control target key end

     0   :  { %10 = vsyncpa [#allocation3], 0  ;;  %s1054_s0 = inlined_call_operand.vmem [shape: f32[2,4,256], index: 0, kind: input, shape index: {}]   ;;  %s1055_s1 = inlined_call_operand.vmem [shape: f32[32,4], index: 1, kind: input, shape index: {}]   ;;  %s1056_s2 = inlined_call_operand.vmem [shape: f32[32,1], index: 2, kind: input, shape index: {}]   ;;  %s1057_s3 = inlined_call_operand.vmem [shape: f32[4,32], index: 3, kind: input, shape index: {}]   ;;  %s1058_s4 = inlined_call_operand.vmem [shape: f32[4,1], index: 4, kind: input, shape index: {}]   ;;  %s1059_s5 = inlined_call_operand.hbm [shape: f32[2,4,256], index: 5, kind: output, shape index: {}]  }
   0x1   :  { %12 = vsyncpa [#allocation3 + $0x1], 0  ;;  %s863_s18 = smov 0   ;;  %s865_s19 = smov 0  }
   0x2   :  { %s867_s20 = smov 0   ;;  %s869_s21 = smov 0  }
   0x3   :  { %s871_s22 = smov 0   ;;  %s873_s23 = smov 0  }
   0x4 LB: > { %s644_s24 = sadd.s32 4294967295, %s828_s23   ;;  %s645_s25 = sadd.s32 4294967294, %s828_s23   ;;  %s828_s23 = sphi %s873_s23, %s18_s23   ;;  %s824_s22 = sphi %s871_s22, %s1066_s22   ;;  %s820_s21 = sphi %s869_s21, %s1065_s21   ;;  %s816_s20 = sphi %s867_s20, %s1064_s20   ;;  %s812_s19 = sphi %s865_s19, %s1063_s19   ;;  %s808_s18 = sphi %s863_s18, %s1062_s18  }
   0x5   : > { %s30_s26 = sadd.s32 1, %s824_s22  ;;  %s151_s27 = sadd.s32 1, %s816_s20 }
   0x6   : > { %p32_p0 = scmp.ge.s32.totalorder %s30_s26, 2  ;;  %p161_p1 = scmp.ne.s32.totalorder %s816_s20, %s812_s19 }
   0x7   : > { %p162_p2 = scmp.eq.s32.totalorder %s644_s24, 1  ;;  %p167_p3 = scmp.ne.s32.totalorder %s812_s19, %s808_s18 }
   0x8   : > { %s1068_s26 = smov (%p32_p0, %s30_s26), 0  ;;  %p168_p5 = scmp.eq.s32.totalorder %s645_s25, 1 }
   0x9   : > { %p903_p4 = por %p162_p2, %p161_p1  ;;  %s146_s29 = ssub.s32 %s824_s22, %s1068_s26 }
   0xa   : > { %p648_p6 = scmp.ge.s32.totalorder %s828_s23, 1  ;;  %p149_p7 = scmp.eq.s32.totalorder %s146_s29, 0 }
   0xb   : > { %p910_p8 = por %p168_p5, %p167_p3  ;;  %p211_p9 = scmp.lt.s32.totalorder %s828_s23, 3 }
   0xc   : > { %s916_s6 = scalar_select %p149_p7, %s816_s20, %s151_s27  }
   0xd   : > { %p212_p10 = pnand %p648_p6, %p211_p9 }
   0xe   : > { %p244_p11 = scmp.lt.s32.totalorder (!%p212_p10), %s820_s21, 1  ;;  %v830_v0 = vmov (!%p212_p10), 0.0   ;;  %v259_v1 = vld [vmem:[%s1056_s2] sm:$0xff] (!%p212_p10)  ;;  %v831_v2 = vmov (!%p212_p10), 0   ;;  %v261_v3 = vld [vmem:[%s1056_s2 + $0x10] sm:$0xff] (!%p212_p10)  ;;  %v260_v4 = vld [vmem:[%s1056_s2 + $0x8] sm:$0xff] (!%p212_p10) }
   0xf   : > { %215 = sbr.rel (%p212_p10) target bundleno = 522 (0x20a), region = 40  ;;  %367 = vmatprep.mubr.f32.mxu0 (!%p212_p10), %v830_v0  ;;  %539 = vmatprep.mubr.f32.mxu1 (!%p212_p10), %v830_v0  ;;  %v262_v5 = vld [vmem:[%s1056_s2 + $0x18] sm:$0xff] (!%p212_p10)  ;;  %vm298_vm0 = vcmask (!%p212_p10), 1043456   ;;  %v255_v8 = vld [vmem:[%s1055_s1] sm:$0xff] (!%p212_p10)  ;;  %vm285_vm1 = vcmask (!%p212_p10), 31744   ;;  %v256_v10 = vld [vmem:[%s1055_s1 + $0x8] sm:$0xff] (!%p212_p10) }
  0x10   : > { %731 = vset.pattern.permute.xlu0 (!%p212_p10), %v831_v2  ;;  %732 = vset.pattern.permute.xlu1 (!%p212_p10), %v831_v2  ;;  %v465_v9 = vld [vmem:[%s1058_s4] sm:$0xf] (!%p212_p10)  ;;  %v257_v11 = vld [vmem:[%s1055_s1 + $0x10] sm:$0xff] (!%p212_p10)  ;;  %v258_v12 = vld [vmem:[%s1055_s1 + $0x18] sm:$0xff] (!%p212_p10)  ;;  %vm471_vm2 = vcmask (!%p212_p10), 261120   ;;  %s240_s17 = sand.u32 (!%p212_p10), 1, %s812_s19  }
  0x11   : > { %265 = vperm.xlu0 (!%p212_p10), %731, %v259_v1   ;;  %275 = vperm.xlu1 (!%p212_p10), %732, %v261_v3   ;;  %s649_s24 = sshll.u32 (!%p212_p10), %s240_s17, 3  ;;  %s552_s10 = scalar_lea.sflag (!%p212_p10), [#allocation3], %s240_s17 }
  0x12   : > { %s242_s27 = scalar_lea.vmem (!%p212_p10), [#allocation2], %s649_s24 }
  0x13   : > { %s568_s29 = sshll.u32 (!%p212_p10), %s242_s27, 4  ;;  %s1009_s29 = int_to_ptr.vmem [resolvable:$true] %s568_s29 }
  0x14   : > { %s750_s11 = scalar_lea.vmem (!%p212_p10), %s1009_s29, 128 }
  0x15   : > { %270 = vperm.xlu0 (!%p212_p10), %731, %v260_v4   ;;  %280 = vperm.xlu1 (!%p212_p10), %732, %v262_v5   ;;  %p751_p12 = scmp.ne.s32.totalorder (!%p212_p10), %s1009_s29, %s750_s11 }
  0x16   : > { %s245_s9 = scalar_select %p244_p11, %s820_s21, 1 }
  0x17   : > { %p752_p13 = pnand %p751_p12, %p903_p4 }
  0x18   : > { %s664_s12 = sshll.u32 %s245_s9, 3 }
  0x19   : > { %s251_s25 = scalar_lea.vmem %s1054_s0, %s664_s12  ;;  %468 = vperm.xlu0 %731, %v465_v9   ;;  %p753_p0 = pneg %p752_p13 }
  0x1a   : > { %v254_v6 = vld [vmem:[%s251_s25] sm:$0xff]  ;;  %s665_s25 = sshll.u32 %s820_s21, 7  ;;  %s832_s21 = smov [#allocation2]  }
  0x1b   : > { %v284_v7 = vcombine.high %v254_v6, %v254_v6  ;;  %s1007_s9 = scalar_lea.hbm %s1059_s5, %s665_s25  ;;  %s754_s12 = sshll.u32 %s832_s21, 4  ;;  %s755_s12 = int_to_ptr.vmem [resolvable:$false] %s754_s12 }
  0x1c   : > { %s756_s13 = scalar_lea.vmem %s755_s12, 256  ;;  %p757_p1 = scmp.lt.s32.totalorder %s1009_s29, %s755_s12 }
  0x1d   : > { %652 = vmatprep.subr.msk.mxu0 %vm298_vm0, %v284_v7  ;;  %p758_p2 = scmp.lt.s32.totalorder %s756_s13, %s750_s11 }
  0x1e   : > { %653 = vmatpush1.msk.msra.mxu0 %vm298_vm0, %v254_v6 }
  0x1f   : > { %654 = vmatmul.mubr.msk.f32.vlgmr.msra.gmra.mrb[0].mxu0 %vm285_vm1, %v255_v8  ;;  %p759_p3 = por %p758_p2, %p757_p1 }
  0x20   : > { %373 = vmatprep.mubr.f32.mxu0 %v830_v0 }
  0x21   : > { %p760_p5 = pnand %p759_p3, %p753_p0 }
  0x23   : > { %655 = vmatmul.mubr.msk.f32.gmra.mrb[2].mxu0 %vm285_vm1, %v256_v10 }
  0x24   : > { %379 = vmatprep.mubr.f32.mxu0 %v830_v0 }
  0x27   : > { %656 = vmatmul.mubr.msk.f32.gmra.mrb[4].mxu0 %vm285_vm1, %v257_v11 }
  0x28   : > { %385 = vmatprep.mubr.f32.mxu0 %v830_v0 }
  0x2b   : > { %657 = vmatmul.mubr.msk.f32.gmra.mrb[6].mxu0 %vm285_vm1, %v258_v12 }
  0x90   : > { %v266_v13 = vpop.permute.xlu0 %265  ;;  %v276_v26 = vpop.permute.xlu1 %275 }
  0x94   : > { %v271_v19 = vpop.permute.xlu0 %270  ;;  %v281_v44 = vpop.permute.xlu1 %280 }
  0xf2   : > { %v369_v14 = vpop.f32.mrb[0].mxu0 }
  0xf3   : > { %v950_v15 = vadd.f32 %v369_v14, %v266_v13  ;;  %v371_v16 = vpop.f32.mrb[1].mxu0 }
  0xf4   : > { %v952_v17 = vadd.f32 %v371_v16, %v266_v13 }
  0xf5   : > { %v392_v18 = vmul.f32 %v950_v15, %v950_v15 }
  0xf6   : > { %v393_v20 = vmul.f32 %v952_v17, %v952_v17  ;;  %v375_v21 = vpop.f32.mrb[2].mxu0 }
  0xf7   : > { %v400_v22 = vmul.f32 %v392_v18, %v950_v15  ;;  %v959_v23 = vadd.f32 %v375_v21, %v271_v19  ;;  %v377_v24 = vpop.f32.mrb[3].mxu0 }
  0xf8   : > { %v401_v25 = vmul.f32 %v393_v20, %v952_v17  ;;  %v962_v27 = vadd.f32 %v377_v24, %v271_v19 }
  0xf9   : > { %v408_v28 = vmul.f32 0.044715, %v400_v22  ;;  %v394_v29 = vmul.f32 %v959_v23, %v959_v23 }
  0xfa   : > { %v409_v30 = vmul.f32 0.044715, %v401_v25  ;;  %v395_v31 = vmul.f32 %v962_v27, %v962_v27  ;;  %v381_v32 = vpop.f32.mrb[4].mxu0 }
  0xfb   : > { %v416_v33 = vadd.f32 %v408_v28, %v950_v15  ;;  %v402_v34 = vmul.f32 %v394_v29, %v959_v23  ;;  %v970_v35 = vadd.f32 %v381_v32, %v276_v26  ;;  %v383_v36 = vpop.f32.mrb[5].mxu0 }
  0xfc   : > { %v403_v37 = vmul.f32 %v395_v31, %v962_v27  ;;  %v973_v38 = vadd.f32 %v383_v36, %v276_v26  ;;  %v417_v39 = vadd.f32 %v409_v30, %v952_v17 }
  0xfd   : > { %v424_v40 = vmul.f32 0.7978846, %v416_v33  ;;  %v410_v41 = vmul.f32 0.044715, %v402_v34  ;;  %v396_v42 = vmul.f32 %v970_v35, %v970_v35 }
  0xfe   : > { %v411_v43 = vmul.f32 0.044715, %v403_v37  ;;  %v397_v45 = vmul.f32 %v973_v38, %v973_v38  ;;  %v387_v46 = vpop.f32.mrb[6].mxu0  ;;  %v425_v47 = vmul.f32 0.7978846, %v417_v39 }
  0xff   : > { %v418_v48 = vadd.f32 %v410_v41, %v959_v23  ;;  %v404_v49 = vmul.f32 %v396_v42, %v970_v35  ;;  %v982_v50 = vadd.f32 %v387_v46, %v281_v44  ;;  %v389_v51 = vpop.f32.mrb[7].mxu0  ;;  %734 = vtanh.f32 %v424_v40 }
 0x100   : > { %v405_v52 = vmul.f32 %v397_v45, %v973_v38  ;;  %v390_v53 = vadd.f32 %v389_v51, %v281_v44  ;;  %v419_v54 = vadd.f32 %v411_v43, %v962_v27  ;;  %736 = vtanh.f32 %v425_v47  ;;  %v464_v47 = vld [vmem:[%s1057_s3] sm:$0xf] }
 0x101   : > { %v426_v55 = vmul.f32 0.7978846, %v418_v48  ;;  %v412_v56 = vmul.f32 0.044715, %v404_v49  ;;  %v398_v57 = vmul.f32 %v982_v50, %v982_v50 }
 0x102   : > { %v413_v58 = vmul.f32 0.044715, %v405_v52  ;;  %v399_v59 = vmul.f32 %v390_v53, %v390_v53  ;;  %v427_v60 = vmul.f32 0.7978846, %v419_v54 }
 0x103   : > { %v420_v61 = vadd.f32 %v412_v56, %v970_v35  ;;  %v406_v62 = vmul.f32 %v398_v57, %v982_v50  ;;  %738 = vtanh.f32 %v426_v55 }
 0x104   : > { %v421_v63 = vadd.f32 %v413_v58, %v973_v38  ;;  %v407_v0 = vmul.f32 %v399_v59, %v390_v53  ;;  %740 = vtanh.f32 %v427_v60 }
 0x105   : > { %v428_v1 = vmul.f32 0.7978846, %v420_v61  ;;  %v414_v2 = vmul.f32 0.044715, %v406_v62 }
 0x106   : > { %v429_v3 = vmul.f32 0.7978846, %v421_v63  ;;  %v415_v4 = vmul.f32 0.044715, %v407_v0 }
 0x107   : > { %742 = vtanh.f32 %v428_v1  ;;  %v422_v5 = vadd.f32 %v414_v2, %v982_v50 }
 0x108   : > { %744 = vtanh.f32 %v429_v3  ;;  %v423_v6 = vadd.f32 %v415_v4, %v390_v53 }
 0x109   : > { %v735_v7 = vpop.eup %734  ;;  %v430_v8 = vmul.f32 0.7978846, %v422_v5 }
 0x10a   : > { %v737_v9 = vpop.eup %736  ;;  %v431_v10 = vmul.f32 0.7978846, %v423_v6  ;;  %v440_v11 = vadd.f32 1.0, %v735_v7 }
 0x10b   : > { %746 = vtanh.f32 %v430_v8  ;;  %v441_v12 = vadd.f32 1.0, %v737_v9 }
 0x10c   : > { %748 = vtanh.f32 %v431_v10  ;;  %v448_v18 = vmul.f32 0.5, %v440_v11 }
 0x10d   : > { %v739_v13 = vpop.eup %738  ;;  %v449_v20 = vmul.f32 0.5, %v441_v12 }
 0x10e   : > { %v741_v14 = vpop.eup %740  ;;  %v442_v16 = vadd.f32 1.0, %v739_v13  ;;  %v456_v26 = vmul.f32 %v448_v18, %v950_v15 }
 0x10f   : > { %v443_v19 = vadd.f32 1.0, %v741_v14  ;;  %v457_v30 = vmul.f32 %v449_v20, %v952_v17 }
 0x110   : > { %v450_v21 = vmul.f32 0.5, %v442_v16 }
 0x111   : > { %v743_v22 = vpop.eup %742  ;;  %v451_v24 = vmul.f32 0.5, %v443_v19 }
 0x112   : > { %v745_v25 = vpop.eup %744  ;;  %v458_v28 = vmul.f32 %v450_v21, %v959_v23  ;;  %v444_v29 = vadd.f32 1.0, %v743_v22 }
 0x113   : > { %v459_v31 = vmul.f32 %v451_v24, %v962_v27  ;;  %v445_v32 = vadd.f32 1.0, %v745_v25 }
 0x114   : > { %v668_v33 = vpack.c.bf16 %v458_v28, %v456_v26  ;;  %v452_v40 = vmul.f32 0.5, %v444_v29 }
 0x115   : > { %v747_v34 = vpop.eup %746  ;;  %v666_v36 = vpack.c.bf16 %v459_v31, %v457_v30  ;;  %v453_v42 = vmul.f32 0.5, %v445_v32 }
 0x116   : > { %v749_v37 = vpop.eup %748  ;;  %v446_v39 = vadd.f32 1.0, %v747_v34  ;;  %v460_v23 = vmul.f32 %v452_v40, %v970_v35  ;;  %v469_v35 = vpop.permute.xlu0 %468 }
 0x117   : > { %667 = vmatprep.subr.bf16.mxu1 %v666_v36  ;;  %v447_v41 = vadd.f32 1.0, %v749_v37  ;;  %v461_v27 = vmul.f32 %v453_v42, %v973_v38 }
 0x118   : > { %669 = vmatpush1.bf16.msra.mxu1 %v668_v33  ;;  %v454_v15 = vmul.f32 0.5, %v446_v39 }
 0x119   : > { %v455_v43 = vmul.f32 0.5, %v447_v41 }
 0x11a   : > { %v462_v17 = vmul.f32 %v454_v15, %v982_v50 }
 0x11b   : > { %v463_v44 = vmul.f32 %v455_v43, %v390_v53 }
 0x11c   : > { %v672_v45 = vpack.c.bf16 %v462_v17, %v460_v23 }
 0x11d   : > { %v670_v46 = vpack.c.bf16 %v463_v44, %v461_v27 }
 0x11f   : > { %671 = vmatprep.subr.bf16.mxu1 %v670_v46 }
 0x120   : > { %673 = vmatpush1.bf16.msra.mxu1 %v672_v45 }
 0x123   : > { %658 = vmatmul.mubr.msk.f32.vlgmr.msra.gmra.mrb[0].mxu1 %vm471_vm2, %v464_v47 }
 0x1f6   : > { %v541_v48 = vpop.f32.mrb[0].mxu1 }
 0x1f7   : > { %v542_v49 = vadd.f32 %v541_v48, %v469_v35  ;;  %v543_v50 = vpop.f32.mrb[1].mxu1 }
 0x1f8   : > { %v544_v38 = vadd.f32 %v543_v50, %v469_v35 }
 0x1fa   : > { %v548_v51 = vcombine.low %v542_v49, %v544_v38 }
 0x1fc   : > { %550 = vst [vmem:[%s242_s27] sm:$0xff] %v548_v51 }
 0x1fd   : > { %763 = shalt.err (!%p760_p5)
}
 0x1fe   : > { %s764_s14 = scalar_lea.hbm %s1007_s9, 128  ;;  %s768_s17 = scalar_lea.hbm %s1059_s5, 256 }
 0x1ff   : > { %p765_p6 = scmp.ne.s32.totalorder %s1007_s9, %s764_s14  ;;  %p769_p10 = scmp.lt.u32.totalorder %s1007_s9, %s1059_s5 }
 0x200   : > { %p770_p11 = scmp.lt.u32.totalorder %s768_s17, %s764_s14  ;;  %p772_p13 = scmp.lt.u32.totalorder %s764_s14, %s1007_s9 }
 0x201   : > { %p766_p7 = pnand %p765_p6, %p903_p4 }
 0x202   : > { %p771_p12 = por %p770_p11, %p769_p10 }
 0x203   : > { %p767_p9 = pneg %p766_p7 }
 0x204   : > { %p773_p0 = por %p772_p13, %p771_p12 }
 0x206   : > { %p774_p1 = pnand %p773_p0, %p767_p9 }
 0x208   : > { %777 = shalt.err (!%p774_p1)
}
 0x209   : > { %674 = dma.vmem_to_hbm [thread:$0]  (%p903_p4), %s1009_s29, 128, %s1007_s9, %s552_s10  }
 0x20a PF: > { %p680_p2 = scmp.ge.s32.totalorder %s828_s23, 2  ;;  %s580_s27 = sand.u32 1, %s808_s18  }
 0x20b   : > { %s581_s7 = scalar_lea.sflag [#allocation3], %s580_s27 }
 0x20c   : > { %p677_p3 = pnand %p680_p2, %p910_p8 }
 0x20e   : > { %803 = dma.done.wait (!%p677_p3), %s581_s7, 128  }
 0x20f   : > { %805 = vsyncadd (!%p677_p3), %s581_s7, 4294967168  ;;  %s18_s23 = sadd.s32 1, %s828_s23   ;;  %s1062_s18 = smov %s812_s19 }
 0x210   : > { %p15_p5 = scmp.ge.s32.totalorder %s18_s23, 4   ;;  %s1063_s19 = smov %s816_s20 }
 0x211   : > { %s1064_s20 = smov %s916_s6  ;;  %s1065_s21 = smov %s824_s22 }
 0x212   : > { %s1066_s22 = smov %s1068_s26  ;;  %17 = sbr.rel (!%p15_p5) target bundleno = 4 (0x4), region = 75 }
 0x219   :  { %586 = vsyncpa [#allocation3], 1 }
 0x21a   :  { %588 = vsyncpa [#allocation3 + $0x1], 1 }

</bundles_post_ra>
